<compile_context>
chip_gen: v5e
topology: v5e:2x2
jax: 0.10.0
libtpu: 0.0.40
codegen_flags: <defaults>
</compile_context>

<pallas_src>
import functools

import jax
import jax.numpy as jnp
from jax.experimental import pallas as pl
from jax.experimental.pallas import tpu as pltpu

FIN, FH, FO = 9, 4, 1
_LANE = 128
_SUB = 8


def _round_up(n: int, m: int) -> int:
    return ((n + m - 1) // m) * m


def _mlp_kernel(x_ref, w1_ref, b1_ref, w2t_ref, b2_ref, o_ref):
    """x_ref: (bt, 9); w1_ref: (9, 4); b1_ref: (1, 4); w2t_ref: (1, 4); b2_ref: (1, 1)."""
    x = x_ref[...]                                                # (bt, 9) f32
    # Layer 1: 9->4 contraction on the MXU with f32 accumulation.
    h = jnp.dot(x, w1_ref[...], preferred_element_type=jnp.float32)
    # Bias + ReLU on the VPU (broadcast of the resident (1, 4) bias row).
    h = jnp.maximum(h + b1_ref[...], 0.0)                         # (bt, 4)
    # Layer 2: only 4 terms -> lane-broadcast multiply + lane reduction (VPU/XLU).
    y = jnp.sum(h * w2t_ref[...], axis=-1, keepdims=True) + b2_ref[...]   # (bt, 1)
    o_ref[...] = y.astype(o_ref.dtype)


@functools.partial(jax.jit, static_argnames=("b_tile",))
def linear_model_forward(x, w1, b1, w2, b2, *, b_tile=8192):
    """x: [B, 9] float32.  Returns [B, 1] == relu(x @ w1 + b1) @ w2 + b2.

    Note: w1/w2 are [in, out]; a PyTorch nn.Linear state dict stores weight as
    [out, in] and must be transposed before being passed here.
    """
    B, fin = x.shape
    assert fin == FIN, f"expected {FIN} input features, got {fin}"

    x = x.astype(jnp.float32)
    w1 = w1.astype(jnp.float32).reshape(FIN, FH)
    b1 = b1.astype(jnp.float32).reshape(1, FH)
    w2t = w2.astype(jnp.float32).reshape(1, FH)     # (4,1) -> (1,4) row for broadcast
    b2 = b2.astype(jnp.float32).reshape(1, FO)

    # Batch tile: multiple of 8 sublanes; large enough to amortize per-step
    # overhead, small enough that the lane-padded (bt, 9) / (bt, 1) blocks
    # (512 B/row each in VMEM) double-buffer in ~16 MiB.
    b_tile = max(_LANE, (int(b_tile) // _LANE) * _LANE)
    bt = min(b_tile, _round_up(B, _SUB))
    if B >= 4096:
        # Ensure >= 2 balanced tiles so v7x's two TensorCores both get work.
        bt = min(bt, _round_up((B + 1) // 2, _LANE))
    n_tiles = pl.cdiv(B, bt)
    if n_tiles == 1:
        bt = B                   # exact single block: no out-of-bounds rows at all

    out = pl.pallas_call(
        _mlp_kernel,
        out_shape=jax.ShapeDtypeStruct((B, FO), jnp.float32),
        grid=(n_tiles,),
        in_specs=[
            pl.BlockSpec((bt, FIN), lambda i: (i, 0)),    # x, native [B, 9] layout
            pl.BlockSpec((FIN, FH), lambda i: (0, 0)),    # w1 (resident across steps)
            pl.BlockSpec((1, FH), lambda i: (0, 0)),      # b1
            pl.BlockSpec((1, FH), lambda i: (0, 0)),      # w2^T row
            pl.BlockSpec((1, FO), lambda i: (0, 0)),      # b2
        ],
        out_specs=pl.BlockSpec((bt, FO), lambda i: (i, 0)),
        compiler_params=pltpu.CompilerParams(
            dimension_semantics=("parallel",),            # lets v7x shard tiles over 2 TCs
            vmem_limit_bytes=32 * 1024 * 1024,
        ),
    )(x, w1, b1, w2t, b2)
    return out                                            # already [B, 1]; no slice/transpose


def init_params(key):
    """Deterministic init mimicking nn.Linear defaults (U[-1/sqrt(fan_in), +1/sqrt(fan_in)])."""
    k1, k2, k3, k4 = jax.random.split(key, 4)
    bound1 = 1.0 / jnp.sqrt(9.0)
    bound2 = 1.0 / jnp.sqrt(4.0)
    w1 = jax.random.uniform(k1, (FIN, FH), jnp.float32, -bound1, bound1)   # [in, out]
    b1 = jax.random.uniform(k2, (FH,), jnp.float32, -bound1, bound1)
    w2 = jax.random.uniform(k3, (FH, FO), jnp.float32, -bound2, bound2)
    b2 = jax.random.uniform(k4, (FO,), jnp.float32, -bound2, bound2)
    return w1, b1, w2, b2


if __name__ == "__main__":
    key = jax.random.PRNGKey(0)
    kx, kp = jax.random.split(key)
    B = 8
    x = jax.random.normal(kx, (B, FIN), jnp.float32)       # batch=8, features=9
    w1, b1, w2, b2 = init_params(kp)

    out = linear_model_forward(x, w1, b1, w2, b2)
    out = jax.block_until_ready(out)

    # Pure-JAX reference check.  Tolerance allows for the MXU's internal f32
    # (multi-pass bf16) accumulation differing slightly from the XLA reference;
    # any real bug (weights/bias/ReLU/layout) would show errors >> 1e-2.
    ref = jnp.maximum(x @ w1 + b1, 0.0) @ w2 + b2
    assert out.shape == (B, FO)
    assert jnp.allclose(out, ref, atol=1e-2, rtol=1e-2)

    print("KERNEL_OK")
</pallas_src>

<mosaic_0001>
module attributes {stable_mosaic.version = 11 : i64} {
  func.func @_mlp_kernel(%arg0: i32, %arg1: memref<8x9xf32, #tpu.memory_space<vmem>>, %arg2: memref<9x4xf32, #tpu.memory_space<vmem>>, %arg3: memref<1x4xf32, #tpu.memory_space<vmem>>, %arg4: memref<1x4xf32, #tpu.memory_space<vmem>>, %arg5: memref<1x1xf32, #tpu.memory_space<vmem>>, %arg6: memref<8x1xf32, #tpu.memory_space<vmem>>) attributes {dimension_semantics = [#tpu.dimension_semantics<parallel>], iteration_bounds = array<i64: 1>, scalar_prefetch = 0 : i64, scratch_operands = 0 : i64, tpu.core_type = #tpu.core_type<tc>, window_params = [{transform_indices = @transform_0, window_bounds = array<i64: 8, 9>}, {pipeline_mode = #tpu.pipeline_mode<synchronous>, transform_indices = @transform_1, window_bounds = array<i64: 9, 4>}, {pipeline_mode = #tpu.pipeline_mode<synchronous>, transform_indices = @transform_2, window_bounds = array<i64: 1, 4>}, {pipeline_mode = #tpu.pipeline_mode<synchronous>, transform_indices = @transform_3, window_bounds = array<i64: 1, 4>}, {pipeline_mode = #tpu.pipeline_mode<synchronous>, transform_indices = @transform_4, window_bounds = array<i64: 1, 1>}, {transform_indices = @transform_5, window_bounds = array<i64: 8, 1>}]} {
    %c0 = arith.constant 0 : index
    %c0_0 = arith.constant 0 : index
    %0 = vector.load %arg1[%c0, %c0_0] : memref<8x9xf32, #tpu.memory_space<vmem>>, vector<8x9xf32>
    %c0_1 = arith.constant 0 : index
    %c0_2 = arith.constant 0 : index
    %1 = vector.load %arg2[%c0_1, %c0_2] : memref<9x4xf32, #tpu.memory_space<vmem>>, vector<9x4xf32>
    %cst = arith.constant dense<0.000000e+00> : vector<8x4xf32>
    %2 = tpu.matmul %0, %1, %cst {dimension_numbers = #tpu.dot_dimension_numbers<[1], [0], [0], [1], [0, 0, 1, 1], [], []>} : vector<8x9xf32>, vector<9x4xf32>, vector<8x4xf32> -> vector<8x4xf32>
    %c0_3 = arith.constant 0 : index
    %c0_4 = arith.constant 0 : index
    %3 = vector.load %arg3[%c0_3, %c0_4] : memref<1x4xf32, #tpu.memory_space<vmem>>, vector<1x4xf32>
    %4 = vector.broadcast %3 : vector<1x4xf32> to vector<8x4xf32>
    %5 = arith.addf %2, %4 : vector<8x4xf32>
    %cst_5 = arith.constant 0.000000e+00 : f32
    %6 = vector.broadcast %cst_5 : f32 to vector<8x4xf32>
    %7 = arith.maximumf %5, %6 : vector<8x4xf32>
    %c0_6 = arith.constant 0 : index
    %c0_7 = arith.constant 0 : index
    %8 = vector.load %arg4[%c0_6, %c0_7] : memref<1x4xf32, #tpu.memory_space<vmem>>, vector<1x4xf32>
    %9 = vector.broadcast %8 : vector<1x4xf32> to vector<8x4xf32>
    %10 = arith.mulf %7, %9 : vector<8x4xf32>
    %cst_8 = arith.constant dense<0.000000e+00> : vector<8xf32>
    %11 = vector.multi_reduction <add>, %10, %cst_8 [1] : vector<8x4xf32> to vector<8xf32>
    %12 = vector.shape_cast %11 : vector<8xf32> to vector<8x1xf32>
    %c0_9 = arith.constant 0 : index
    %c0_10 = arith.constant 0 : index
    %13 = vector.load %arg5[%c0_9, %c0_10] : memref<1x1xf32, #tpu.memory_space<vmem>>, vector<1x1xf32>
    %14 = vector.broadcast %13 : vector<1x1xf32> to vector<8x1xf32>
    %15 = arith.addf %12, %14 : vector<8x1xf32>
    %c0_11 = arith.constant 0 : index
    %c0_12 = arith.constant 0 : index
    %16 = vector.load %arg6[%c0_11, %c0_12] : memref<8x1xf32, #tpu.memory_space<vmem>>, vector<8x1xf32>
    tpu.vector_store %arg6[%c0_11, %c0_12], %15 {strides = array<i32>} : memref<8x1xf32, #tpu.memory_space<vmem>>, vector<8x1xf32>,
    return
  }
  func.func @transform_0(%arg0: i32) -> (i32, i32) {
    %c0_i32 = arith.constant 0 : i32
    %c0_i32_0 = arith.constant 0 : i32
    return %arg0, %c0_i32 : i32, i32
  }
  func.func @transform_1(%arg0: i32) -> (i32, i32) {
    %c0_i32 = arith.constant 0 : i32
    %c0_i32_0 = arith.constant 0 : i32
    %c0_i32_1 = arith.constant 0 : i32
    return %c0_i32, %c0_i32_0 : i32, i32
  }
  func.func @transform_2(%arg0: i32) -> (i32, i32) {
    %c0_i32 = arith.constant 0 : i32
    %c0_i32_0 = arith.constant 0 : i32
    %c0_i32_1 = arith.constant 0 : i32
    return %c0_i32, %c0_i32_0 : i32, i32
  }
  func.func @transform_3(%arg0: i32) -> (i32, i32) {
    %c0_i32 = arith.constant 0 : i32
    %c0_i32_0 = arith.constant 0 : i32
    %c0_i32_1 = arith.constant 0 : i32
    return %c0_i32, %c0_i32_0 : i32, i32
  }
  func.func @transform_4(%arg0: i32) -> (i32, i32) {
    %c0_i32 = arith.constant 0 : i32
    %c0_i32_0 = arith.constant 0 : i32
    %c0_i32_1 = arith.constant 0 : i32
    return %c0_i32, %c0_i32_0 : i32, i32
  }
  func.func @transform_5(%arg0: i32) -> (i32, i32) {
    %c0_i32 = arith.constant 0 : i32
    %c0_i32_0 = arith.constant 0 : i32
    return %arg0, %c0_i32 : i32, i32
  }
}

</mosaic_0001>

<bundles_post_ra>
// kernel: linear_model_forward.1
= control target key start
LH: loop header
LB: loop body
LE: loop exit
PB: predicated region body
PF: predicated region fallthrough
CT: control target
= control target key end

     0   :  { %vm33_vm0 = vcmask 1040384   ;;  %vm29_vm1 = vcmask 72704   ;;  %vm63_vm2 = vcmask 31744   ;;  %vm72_vm3 = vcmask 7168   ;;  %s134_s1 = inlined_call_operand.vmem [shape: f32[9,4], index: 1, kind: input, shape index: {}]   ;;  %s135_s0 = inlined_call_operand.vmem [shape: f32[8,9], index: 0, kind: input, shape index: {}]   ;;  %s136_s2 = inlined_call_operand.vmem [shape: f32[1,4], index: 2, kind: input, shape index: {}]   ;;  %s137_s3 = inlined_call_operand.vmem [shape: f32[1,4], index: 3, kind: input, shape index: {}]   ;;  %s138_s4 = inlined_call_operand.<no memory space> [shape: f32[1,1], index: 4, kind: input, shape index: {}]   ;;  %s139_s5 = inlined_call_operand.vmem [shape: f32[8,1], index: 5, kind: output, shape index: {}]  }
   0x1   :  { %v24_v0 = vld [vmem:[%s134_s1 + $0x8] sm:$0x1]  ;;  %v23_v1 = vld [vmem:[%s134_s1] sm:$0xff]  ;;  %v10_v3 = vstv %s138_s4 }
   0x2   :  { %78 = vmatpush.msk.msra.mxu0 %vm33_vm0, %v24_v0  ;;  %v22_v2 = vld [vmem:[%s135_s0] sm:$0xff]  ;;  %11 = vst [vmem:[#allocation2] sm:$0x1] %v10_v3 }
   0x3   :  { %v80_v4 = vld [vmem:[%s136_s2] ss:$0 sm:$0xff] }
   0x4   :  { %52 = vmatpush.msra.mxu0 %v23_v1  ;;  %v81_v7 = vld [vmem:[%s137_s3] ss:$0 sm:$0xff] }
   0x5   :  { %79 = vmatmul.msk.f32.vlgmr.msra.gmra.mxu0 %vm29_vm1, %v22_v2 }
   0x9   :  { %v82_v11 = vld [vmem:[#allocation2] ss:$0 sm:$0xff] }
  0x82   :  { %v54_v5 = vpop.f32.mrf.mxu0 }
  0x83   :  { %v55_v6 = vadd.f32 %v80_v4, %v54_v5 }
  0x85   :  { %v57_v8 = vmax.f32 %v55_v6, 0.0 }
  0x87   :  { %v62_v9 = vmul.f32 %v81_v7, %v57_v8 }
  0x89   :  { %v64_v10 = vsel %vm63_vm2, %v62_v9, 0.0 }
  0x8a   :  { %65 = vadd.xlane.f32.xlu0 %v64_v10 }
  0xfd   :  { %v66_v12 = vpop.xlane.xlu0 %65 }
  0xfe   :  { %v71_v13 = vadd.f32 %v82_v11, %v66_v12 }
 0x100   :  { %73 = vst.msk [vmem:[%s139_s5] sm:$0xff] %vm72_vm3, %v71_v13 }

</bundles_post_ra>
